<compile_context>
chip_gen: v6e
topology: v6e:2x2x1
jax: 0.10.0
libtpu: 0.0.40
codegen_flags: <defaults>
</compile_context>

<pallas_src>
import functools
import math

import jax
import jax.numpy as jnp
from jax.experimental import pallas as pl
from jax.experimental.pallas import tpu as pltpu

_MIB = 1024 * 1024


def _round_up(x, m):
    return ((x + m - 1) // m) * m


def _pick_tile(dim_pad, cap, multiple=128, min_blocks=1):
    """Largest tile (multiple of `multiple`, <= cap) that divides dim_pad.

    Prefers tiles that give at least `min_blocks` blocks (megacore sharding on
    v7x); falls back gracefully if that is impossible.  Because the tile always
    divides the padded dim there is never pad-to-tile blow-up.
    """
    assert dim_pad % multiple == 0, (dim_pad, multiple)
    assert cap >= multiple, (cap, multiple)
    cands = set()
    t = multiple
    while t <= min(cap, dim_pad):
        if dim_pad % t == 0:
            cands.add(t)
        t *= 2
    if dim_pad <= cap:
        cands.add(dim_pad)
    ok = [t for t in cands if dim_pad // t >= min_blocks]
    pool = ok if ok else list(cands)
    return max(pool)


def _prep_operand(arr, rows, cols):
    """Pad (and cast to bf16 in the same pass) only if the shape needs it.

    If the array already has the padded shape it is fed to the kernel as-is
    (f32 or bf16) and cast tile-by-tile on the VPU inside the kernel, avoiding
    an extra HBM read+write pass over a large operand such as adj.
    """
    r, c = arr.shape
    assert r <= rows and c <= cols, (arr.shape, rows, cols)
    if r == rows and c == cols:
        return arr
    return jnp.pad(arr.astype(jnp.bfloat16), ((0, rows - r), (0, cols - c)))


def _make_mm_kernel(*, tk, b_resident, has_bias):
    """out = a @ b (+ bias) with f32 accumulation; bf16 cast done in-kernel."""

    def kernel(*refs):
        if has_bias:
            a_ref, b_ref, bias_ref, o_ref, acc_ref = refs
        else:
            a_ref, b_ref, o_ref, acc_ref = refs
        kk = pl.program_id(2)

        @pl.when(kk == 0)
        def _init():
            acc_ref[...] = jnp.zeros_like(acc_ref)

        a = a_ref[...].astype(jnp.bfloat16)          # no-op if already bf16
        if b_resident:
            # B lives fully in VMEM; slice the current K block dynamically.
            off = pl.multiple_of(kk * tk, 128)
            b = b_ref[pl.ds(off, tk), :].astype(jnp.bfloat16)
        else:
            b = b_ref[...].astype(jnp.bfloat16)
        acc_ref[...] += jnp.dot(a, b, preferred_element_type=jnp.float32)

        @pl.when(kk == pl.num_programs(2) - 1)
        def _done():
            acc = acc_ref[...]
            if has_bias:
                acc = acc + bias_ref[...]
            o_ref[...] = acc.astype(o_ref.dtype)

    return kernel


def _matmul_padded(a, b, bias=None, *, m_pad, k_pad, n_pad,
                   out_dtype=jnp.float32,
                   tm_max=1024, tk_max=1024, tn_max=512,
                   min_m_blocks=2,
                   vmem_budget_bytes=24 * _MIB,
                   b_resident_max_bytes=8 * _MIB):
    """Tiled Pallas matmul returning the PADDED (m_pad, n_pad) result."""
    a_p = _prep_operand(a, m_pad, k_pad)
    b_p = _prep_operand(b, k_pad, n_pad)

    tm = _pick_tile(m_pad, tm_max, 128, min_blocks=min_m_blocks)
    tk = _pick_tile(k_pad, tk_max, 128)
    tn = _pick_tile(n_pad, tn_max, 128)

    a_elt = a_p.dtype.itemsize
    b_elt = b_p.dtype.itemsize
    o_elt = jnp.dtype(out_dtype).itemsize
    b_resident = 2 * k_pad * tn * b_elt <= b_resident_max_bytes

    def vmem_use(tm_, tk_, tn_, res_):
        b_rows = k_pad if res_ else tk_
        return (2 * tm_ * tk_ * a_elt          # A double-buffered
                + 2 * b_rows * tn_ * b_elt     # B (resident or per-step)
                + 2 * tm_ * tn_ * o_elt        # output tiles
                + tm_ * tn_ * 4                # f32 accumulator scratch
                + (2 * tn_ * 4 if bias is not None else 0))

    # Keep the working set under the per-TensorCore budget (v7x: 32 MiB scoped).
    for _ in range(16):
        if vmem_use(tm, tk, tn, b_resident) <= vmem_budget_bytes:
            break
        if tk > 128:
            tk = _pick_tile(k_pad, tk // 2, 128)
        elif tm > 128:
            tm = _pick_tile(m_pad, tm // 2, 128, min_blocks=min_m_blocks)
        elif b_resident:
            b_resident = False
        elif tn > 128:
            tn = _pick_tile(n_pad, tn // 2, 128)
        else:
            break

    grid = (m_pad // tm, n_pad // tn, k_pad // tk)

    a_spec = pl.BlockSpec((tm, tk), lambda i, j, kk: (i, kk))
    if b_resident:
        b_spec = pl.BlockSpec((k_pad, tn), lambda i, j, kk: (0, j))
    else:
        b_spec = pl.BlockSpec((tk, tn), lambda i, j, kk: (kk, j))
    o_spec = pl.BlockSpec((tm, tn), lambda i, j, kk: (i, j))

    in_specs = [a_spec, b_spec]
    operands = [a_p, b_p]
    if bias is not None:
        nb = bias.shape[0]
        bias_p = jnp.pad(bias.astype(jnp.float32).reshape(1, nb),
                         ((0, 0), (0, n_pad - nb)))
        in_specs.append(pl.BlockSpec((1, tn), lambda i, j, kk: (0, j)))
        operands.append(bias_p)

    kernel = _make_mm_kernel(tk=tk, b_resident=b_resident,
                             has_bias=bias is not None)

    return pl.pallas_call(
        kernel,
        out_shape=jax.ShapeDtypeStruct((m_pad, n_pad), out_dtype),
        grid_spec=pltpu.PrefetchScalarGridSpec(
            num_scalar_prefetch=0,
            grid=grid,
            in_specs=in_specs,
            out_specs=o_spec,
            scratch_shapes=[pltpu.VMEM((tm, tn), jnp.float32)],
        ),
        compiler_params=pltpu.CompilerParams(
            dimension_semantics=("parallel", "parallel", "arbitrary"),
            vmem_limit_bytes=32 * _MIB,   # fits v7x scoped budget; v5e/v6e ok
        ),
    )(*operands)


def prepare_adjacency(adj):
    """Optional: cast+pad adj to bf16 once so repeated layers/steps reuse it."""
    n = adj.shape[0]
    n_pad = _round_up(n, 256)
    if adj.shape == (n_pad, n_pad):
        return adj.astype(jnp.bfloat16)
    return jnp.pad(adj.astype(jnp.bfloat16),
                   ((0, n_pad - n), (0, n_pad - n)))


def graph_convolution(x, adj, weights, bias=None, *,
                      tm_max=1024, tk_max=1024, tn_max=512,
                      b_resident_max_bytes=8 * _MIB):
    """output = adj @ (x @ weights) [+ bias]; association chosen by cost.

    `adj` may be the logical (N, N) array (f32 fine; cast happens in-kernel)
    or the output of prepare_adjacency() (padded bf16, zero wrapper passes).
    """
    N, in_f = x.shape
    in_f2, out_f = weights.shape
    assert in_f == in_f2, (x.shape, weights.shape)
    n_pad = _round_up(N, 256)
    assert adj.shape in ((N, N), (n_pad, n_pad)), adj.shape
    inf_pad = _round_up(in_f, 128)
    outf_pad = _round_up(out_f, 128)

    mm = functools.partial(_matmul_padded, tm_max=tm_max, tk_max=tk_max,
                           tn_max=tn_max,
                           b_resident_max_bytes=b_resident_max_bytes)

    if out_f <= in_f:
        # Narrow first: support = x @ W (bf16, padded), then adj @ support.
        support = mm(x, weights, m_pad=n_pad, k_pad=inf_pad, n_pad=outf_pad,
                     out_dtype=jnp.bfloat16)
        out = mm(adj, support, bias=bias, m_pad=n_pad, k_pad=n_pad,
                 n_pad=outf_pad, out_dtype=jnp.float32)
    else:
        # (adj @ x) @ W keeps the N^2 matmul only in_f wide (< out_f).
        tmp = mm(adj, x, m_pad=n_pad, k_pad=n_pad, n_pad=inf_pad,
                 out_dtype=jnp.bfloat16)
        out = mm(tmp, weights, bias=bias, m_pad=n_pad, k_pad=inf_pad,
                 n_pad=outf_pad, out_dtype=jnp.float32)
    return out[:N, :out_f]


class GraphConvolutionPallas:
    """Re-implementation of the PyTorch GraphConvolution module."""

    def __init__(self, in_features, out_features, bias=True, key=None):
        if key is None:
            key = jax.random.PRNGKey(0)
        self.in_features = in_features
        self.out_features = out_features
        stdv = 1.0 / math.sqrt(out_features)   # matches weights.size(1)
        kw, kb = jax.random.split(key)
        self.weights = jax.random.uniform(
            kw, (in_features, out_features), jnp.float32,
            minval=-stdv, maxval=stdv)
        if bias:
            self.bias = jax.random.uniform(
                kb, (out_features,), jnp.float32, minval=-stdv, maxval=stdv)
        else:
            self.bias = None

    def __call__(self, x, adj):
        return graph_convolution(x, adj, self.weights, self.bias)


if __name__ == "__main__":
    key = jax.random.PRNGKey(0)

    def make_adj(k, n):
        a = (jax.random.uniform(k, (n, n)) > 0.5).astype(jnp.float32)
        a = a + jnp.eye(n, dtype=jnp.float32)            # self loops
        return a / jnp.sum(a, axis=1, keepdims=True)     # row normalize

    def ref_gcn(x, adj, w, b):
        r = adj @ (x @ w)
        return r + b if b is not None else r

    # Case 1: out_f > in_f -> (adj @ x) @ W association; small N so adj gets a
    # single fused pad+cast pass in the wrapper.
    N, IN_F, OUT_F = 16, 32, 64
    k_x, k_adj, k_p, key = jax.random.split(key, 4)
    x = jax.random.normal(k_x, (N, IN_F), jnp.float32)
    adj = make_adj(k_adj, N)
    layer = GraphConvolutionPallas(IN_F, OUT_F, bias=True, key=k_p)
    out = jax.block_until_ready(layer(x, adj))
    ref = ref_gcn(x, adj, layer.weights, layer.bias)
    assert out.shape == (N, OUT_F)
    assert jnp.allclose(out, ref, atol=5e-2, rtol=5e-2), "case 1 mismatch"

    # Case 2: out_f <= in_f, N already 256-aligned -> f32 adj is fed straight
    # to the kernel (no wrapper pad/cast pass) and cast to bf16 on the VPU;
    # bf16 padded `support` flows between the two pallas_calls untouched.
    N2, IN2, OUT2 = 256, 96, 64
    k_x, k_adj, k_p, key = jax.random.split(key, 4)
    x2 = jax.random.normal(k_x, (N2, IN2), jnp.float32)
    adj2 = make_adj(k_adj, N2)
    layer2 = GraphConvolutionPallas(IN2, OUT2, bias=True, key=k_p)
    ref2 = ref_gcn(x2, adj2, layer2.weights, layer2.bias)
    out2 = jax.block_until_ready(layer2(x2, adj2))
    assert out2.shape == (N2, OUT2)
    assert jnp.allclose(out2, ref2, atol=5e-2, rtol=5e-2), "case 2 mismatch"

    # Case 3: small tile caps -> multi-step k grid, exercising pl.when
    # init/finalize, the f32 accumulator and the dynamic pl.ds slice into the
    # VMEM-resident support block.
    out3 = jax.block_until_ready(
        graph_convolution(x2, adj2, layer2.weights, layer2.bias,
                          tm_max=128, tk_max=128, tn_max=128))
    assert jnp.allclose(out3, ref2, atol=5e-2, rtol=5e-2), "case 3 mismatch"

    # Case 4: force the non-resident (per-k-step DMA) B path.
    out4 = jax.block_until_ready(
        graph_convolution(x2, adj2, layer2.weights, layer2.bias,
                          tk_max=128, b_resident_max_bytes=0))
    assert jnp.allclose(out4, ref2, atol=5e-2, rtol=5e-2), "case 4 mismatch"

    # Case 5: pre-prepared (padded bf16) adjacency, as cached across layers.
    out5 = jax.block_until_ready(
        graph_convolution(x2, prepare_adjacency(adj2),
                          layer2.weights, layer2.bias))
    assert jnp.allclose(out5, ref2, atol=5e-2, rtol=5e-2), "case 5 mismatch"

    print("KERNEL_OK")
</pallas_src>

<mosaic_0001>
module attributes {stable_mosaic.version = 11 : i64} {
  func.func @kernel(%arg0: i32, %arg1: i32, %arg2: i32, %arg3: memref<128x256xbf16, #tpu.memory_space<vmem>>, %arg4: memref<256x128xbf16, #tpu.memory_space<vmem>>, %arg5: memref<128x128xbf16, #tpu.memory_space<vmem>>, %arg6: memref<128x128xf32, #tpu.memory_space<vmem>>) attributes {dimension_semantics = [#tpu.dimension_semantics<parallel>, #tpu.dimension_semantics<parallel>, #tpu.dimension_semantics<arbitrary>], iteration_bounds = array<i64: 2, 1, 1>, scalar_prefetch = 0 : i64, scratch_operands = 1 : i64, tpu.core_type = #tpu.core_type<tc>, window_params = [{transform_indices = @transform_0, window_bounds = array<i64: 128, 256>}, {transform_indices = @transform_1, window_bounds = array<i64: 256, 128>}, {transform_indices = @transform_2, window_bounds = array<i64: 128, 128>}]} {
    %c0_i32 = arith.constant 0 : i32
    %0 = arith.cmpi eq, %arg2, %c0_i32 : i32
    %1 = arith.extui %0 : i1 to i32
    %c0_i32_0 = arith.constant 0 : i32
    %2 = arith.cmpi ne, %1, %c0_i32_0 : i32
    scf.if %2 {
      %cst_9 = arith.constant 0.000000e+00 : f32
      %15 = vector.broadcast %cst_9 : f32 to vector<128x128xf32>
      %c0_10 = arith.constant 0 : index
      %c0_11 = arith.constant 0 : index
      %16 = vector.load %arg6[%c0_10, %c0_11] : memref<128x128xf32, #tpu.memory_space<vmem>>, vector<128x128xf32>
      tpu.vector_store %arg6[%c0_10, %c0_11], %15 {strides = array<i32>} : memref<128x128xf32, #tpu.memory_space<vmem>>, vector<128x128xf32>,
    } else {
    }
    %c0 = arith.constant 0 : index
    %c0_1 = arith.constant 0 : index
    %3 = vector.load %arg3[%c0, %c0_1] : memref<128x256xbf16, #tpu.memory_space<vmem>>, vector<128x256xbf16>
    %c256_i32 = arith.constant 256 : i32
    %4 = arith.muli %arg2, %c256_i32 : i32
    %5 = tpu.assume_multiple %4, 128 : i32
    %6 = arith.index_cast %5 : i32 to index
    %c0_2 = arith.constant 0 : index
    %7 = vector.load %arg4[%6, %c0_2] : memref<256x128xbf16, #tpu.memory_space<vmem>>, vector<256x128xbf16>
    %c0_3 = arith.constant 0 : index
    %c0_4 = arith.constant 0 : index
    %8 = vector.load %arg6[%c0_3, %c0_4] : memref<128x128xf32, #tpu.memory_space<vmem>>, vector<128x128xf32>
    %cst = arith.constant dense<0.000000e+00> : vector<128x128xf32>
    %9 = tpu.matmul %3, %7, %cst {dimension_numbers = #tpu.dot_dimension_numbers<[1], [0], [0], [1], [0, 0, 1, 1], [], []>} : vector<128x256xbf16>, vector<256x128xbf16>, vector<128x128xf32> -> vector<128x128xf32>
    %10 = arith.addf %8, %9 : vector<128x128xf32>
    %c0_5 = arith.constant 0 : index
    %c0_6 = arith.constant 0 : index
    %11 = vector.load %arg6[%c0_5, %c0_6] : memref<128x128xf32, #tpu.memory_space<vmem>>, vector<128x128xf32>
    tpu.vector_store %arg6[%c0_5, %c0_6], %10 {strides = array<i32>} : memref<128x128xf32, #tpu.memory_space<vmem>>, vector<128x128xf32>,
    %c0_i32_7 = arith.constant 0 : i32
    %12 = arith.cmpi eq, %arg2, %c0_i32_7 : i32
    %13 = arith.extui %12 : i1 to i32
    %c0_i32_8 = arith.constant 0 : i32
    %14 = arith.cmpi ne, %13, %c0_i32_8 : i32
    scf.if %14 {
      %c0_9 = arith.constant 0 : index
      %c0_10 = arith.constant 0 : index
      %15 = vector.load %arg6[%c0_9, %c0_10] : memref<128x128xf32, #tpu.memory_space<vmem>>, vector<128x128xf32>
      %16 = arith.truncf %15 : vector<128x128xf32> to vector<128x128xbf16>
      %c0_11 = arith.constant 0 : index
      %c0_12 = arith.constant 0 : index
      %17 = vector.load %arg5[%c0_11, %c0_12] : memref<128x128xbf16, #tpu.memory_space<vmem>>, vector<128x128xbf16>
      tpu.vector_store %arg5[%c0_11, %c0_12], %16 {strides = array<i32>} : memref<128x128xbf16, #tpu.memory_space<vmem>>, vector<128x128xbf16>,
    } else {
    }
    return
  }
  func.func @transform_0(%arg0: i32, %arg1: i32, %arg2: i32) -> (i32, i32) {
    %c0_i32 = arith.constant 0 : i32
    return %arg0, %arg2 : i32, i32
  }
  func.func @transform_1(%arg0: i32, %arg1: i32, %arg2: i32) -> (i32, i32) {
    %c0_i32 = arith.constant 0 : i32
    %c0_i32_0 = arith.constant 0 : i32
    return %c0_i32, %arg1 : i32, i32
  }
  func.func @transform_2(%arg0: i32, %arg1: i32, %arg2: i32) -> (i32, i32) {
    %c0_i32 = arith.constant 0 : i32
    return %arg0, %arg1 : i32, i32
  }
}

</mosaic_0001>

<bundles_post_ra>
// kernel: tpu_custom_call.1
= control target key start
LH: loop header
LB: loop body
LE: loop exit
PB: predicated region body
PF: predicated region fallthrough
CT: control target
= control target key end

     0   :  { %7 = vsyncpa [#allocation4], 0  ;;  %s1531_s0 = inlined_call_operand.hbm [shape: bf16[256,256], index: 0, kind: input, shape index: {}]   ;;  %s1532_s1 = inlined_call_operand.hbm [shape: bf16[256,128], index: 1, kind: input, shape index: {}]   ;;  %s1533_s2 = inlined_call_operand.hbm [shape: bf16[256,128], index: 2, kind: output, shape index: {}]  }
   0x1   :  { %9 = vsyncpa [#allocation4 + $0x1], 0 }
   0x2   :  { %10 = vsyncpa [#allocation7], 0 }
   0x3   :  { %11 = vsyncpa [#allocation5], 0 }
   0x4   :  { %13 = vsyncpa [#allocation5 + $0x1], 0  ;;  %s1320_s9 = smov 0   ;;  %s1322_s10 = smov 0  }
   0x5   :  { %s1324_s11 = smov 0   ;;  %s1326_s12 = smov 0  }
   0x6   :  { %s1328_s13 = smov 0   ;;  %s1330_s14 = smov 0  }
   0x7 LB: > { %s825_s15 = sadd.s32 4294967295, %s1294_s14   ;;  %s826_s16 = sadd.s32 4294967294, %s1294_s14   ;;  %s1294_s14 = sphi %s1330_s14, %s19_s14   ;;  %s1290_s13 = sphi %s1328_s13, %s1551_s13   ;;  %s1286_s12 = sphi %s1326_s12, %s1550_s12   ;;  %s1282_s11 = sphi %s1324_s11, %s1549_s11   ;;  %s1278_s10 = sphi %s1322_s10, %s1548_s10   ;;  %s1274_s9 = sphi %s1320_s9, %s1547_s9  }
   0x8   : > { %p60_p0 = scmp.ne.s32.totalorder %s1278_s10, %s1274_s9  ;;  %p1354_p1 = scmp.eq.s32.totalorder %s825_s15, 0 }
   0x9   : > { %p1358_p2 = scmp.eq.s32.totalorder %s825_s15, 1  ;;  %p118_p3 = scmp.eq.s32.totalorder %s826_s16, 1 }
   0xa   : > { %p1364_p4 = por %p1354_p1, %p60_p0  ;;  %p827_p5 = scmp.ge.s32.totalorder %s1294_s14, 1 }
   0xb   : > { %p1369_p6 = por %p118_p3, %p60_p0  ;;  %p125_p7 = scmp.lt.s32.totalorder %s1294_s14, 3 }
   0xc   : > { %s1537_s19 = scalar_select %p1364_p4, 1, 0 }
   0xd   : > { %s1538_s20 = scalar_select %p1369_p6, 1, 0 }
   0xe   : > { %p1374_p8 = pnand %p827_p5, %p125_p7  ;;  %s1296_s22 = smov [#allocation6]  }
   0xf   : > { %s139_s23 = sshll.u32 %s1296_s22, 4  ;;  %s38_s25 = sadd.s32 1, %s1290_s13  ;;  %s140_s23 = int_to_ptr.vmem [resolvable:$true] %s139_s23 }
  0x10   : > { %p1045_p9 = pneg %p1374_p8  ;;  %s1167_s26 = scalar_lea.vmem %s140_s23, 2048 }
  0x11   : > { %p1168_p13 = scmp.ne.s32.totalorder %s140_s23, %s1167_s26  ;;  %p1175_p5 = scmp.lt.s32.totalorder %s140_s23, %s140_s23 }
  0x12   : > { %p1383_p11 = pnand %p1045_p9, %p1354_p1  ;;  %p1176_p7 = scmp.lt.s32.totalorder %s1167_s26, %s1167_s26 }
  0x14   : > { %p1158_p12 = pneg %p1383_p11  ;;  %p1177_p6 = por %p1176_p7, %p1175_p5 }
  0x16   : > { %p1170_p0 = pnand %p1168_p13, %p1158_p12 }
  0x18   : > { %p1171_p3 = pneg %p1170_p0 }
  0x1a   : > { %p1178_p4 = pnand %p1177_p6, %p1171_p3 }
  0x1c   : > { %1181 = shalt.err (!%p1178_p4)
}
  0x1d   : > { %s1297_s27 = smov 64   ;;  %s1298_s28 = smov 4  }
  0x1e   : > { %1048 = dma.hbm_to_vmem [thread:$0]  (!%p1383_p11), %s1532_s1, 2048, %s140_s23, [#allocation7], %s1297_s27, %s1297_s27, %s1298_s28  }
  0x1f   : > { %p40_p6 = scmp.ge.s32.totalorder %s38_s25, 2  ;;  %s47_s3 = sadd.s32 1, %s1282_s11 }
  0x20   : > { %p54_p4 = scmp.ne.s32.totalorder %s1282_s11, %s1278_s10  ;;  %p55_p9 = scmp.eq.s32.totalorder %s1294_s14, 0 }
  0x21   : > { %s1553_s25 = smov (%p40_p6, %s38_s25), 0  ;;  %p1058_p0 = scmp.lt.s32.totalorder %s1294_s14, 2 }
  0x22   : > { %p1401_p12 = por %p55_p9, %p54_p4  ;;  %p1407_p13 = por %p1358_p2, %p54_p4 }
  0x23   : > { %s42_s6 = ssub.s32 %s1290_s13, %s1553_s25  ;;  %s153_s7 = sand.u32 1, %s1282_s11  }
  0x24   : > { %p45_p11 = scmp.eq.s32.totalorder %s42_s6, 0  ;;  %s830_s8 = sshll.u32 %s153_s7, 7 }
  0x25   : > { %s892_s16 = sshll.u32 %s1290_s13, 11  ;;  %s157_s26 = scalar_lea.vmem [#allocation3], %s830_s8 }
  0x26   : > { %s1416_s15 = scalar_select %p45_p11, %s1282_s11, %s47_s3  }
  0x27   : > { %s166_s24 = scalar_lea.hbm %s1531_s0, %s892_s16  ;;  %s167_s27 = sshll.u32 %s157_s26, 4  ;;  %s168_s27 = int_to_ptr.vmem [resolvable:$true] %s167_s27 }
  0x28   : > { %p1424_p2 = pnand %p1058_p0, %p1401_p12  ;;  %s154_s28 = scalar_lea.sflag [#allocation4], %s153_s7 }
  0x29   : > { %s1195_s29 = scalar_lea.vmem %s168_s27, 2048  ;;  %s1299_s30 = smov [#allocation3]  }
  0x2a   : > { %p1184_p3 = pneg %p1424_p2  ;;  %p1196_p5 = scmp.ne.s32.totalorder %s168_s27, %s1195_s29 }
  0x2b   : > { %s1200_s3 = sshll.u32 %s1299_s30, 4  ;;  %s1201_s3 = int_to_ptr.vmem [resolvable:$false] %s1200_s3 }
  0x2c   : > { %p1198_p7 = pnand %p1196_p5, %p1184_p3  ;;  %s1202_s6 = scalar_lea.vmem %s1201_s3, 4096 }
  0x2d   : > { %p1203_p4 = scmp.lt.s32.totalorder %s168_s27, %s1201_s3  ;;  %p1204_p9 = scmp.lt.s32.totalorder %s1202_s6, %s1195_s29 }
  0x2e   : > { %p1199_p6 = pneg %p1198_p7 }
  0x2f   : > { %p1205_p11 = por %p1204_p9, %p1203_p4 }
  0x31   : > { %p1206_p10 = pnand %p1205_p11, %p1199_p6 }
  0x33   : > { %1209 = shalt.err (!%p1206_p10)
}
  0x34   : > { %s1300_s4 = smov 128   ;;  %s1301_s8 = smov 8  }
  0x35   : > { %1052 = dma.hbm_to_vmem [thread:$0]  (!%p1424_p2), %s166_s24, 2048, %s168_s27, %s154_s28, %s1300_s4, %s1300_s4, %s1301_s8  }
  0x36   : > { %179 = sbr.rel (%p1374_p8) target bundleno = 336 (0x150), region = 28  ;;  %s1435_s7 = sand.u32 (!%p1374_p8), 1, %s1278_s10  }
  0x37   : > { %s835_s16 = sshll.u32 (!%p1374_p8), %s1435_s7, 7  ;;  %s182_s22 = scalar_lea.sflag (!%p1374_p8), [#allocation4], %s1435_s7 }
  0x38   : > { %s1439_s23 = scalar_lea.vmem (!%p1374_p8), [#allocation3], %s835_s16  ;;  %p1544_p12 = scmp.ne.s32.totalorder (!%p1374_p8), %s1537_s19, 0 }
  0x3b   : > { %1261 = dma.done.wait (%p1544_p12), %s182_s22, 2048  }
  0x3c   : > { %1263 = vsyncadd (%p1544_p12), %s182_s22, 4294965248 }
  0x3d   : > { %1265 = dma.done.wait (%p1354_p1), [#allocation7], 2048  }
  0x3e   : > { %1267 = vsyncadd (%p1354_p1), [#allocation7], 4294965248  ;;  %v1116_v0 = vld [vmem:[#allocation6 + $0x78] sm:$0xff]   ;;  %v1118_v2 = vld [vmem:[#allocation6 + $0x70] sm:$0xff]   ;;  %s837_s17 = sshll.u32 %s1435_s7, 6  ;;  %s909_s24 = sshll.u32 %s1286_s12, 10 }
  0x3f   : > { %v1117_v1 = vld [vmem:[#allocation6 + $0x38] sm:$0xff]   ;;  %957 = vmatprep.subr.bf16.mxu0 %v1116_v0  ;;  %1021 = vmatprep.subr.bf16.mxu1 %v1116_v0  ;;  %v1119_v3 = vld [vmem:[#allocation6 + $0x30] sm:$0xff]   ;;  %v1120_v4 = vld [vmem:[#allocation6 + $0x68] sm:$0xff]   ;;  %s1466_s19 = scalar_lea.vmem [#allocation8], %s837_s17  ;;  %s1481_s18 = scalar_lea.hbm %s1533_s2, %s909_s24 }
  0x40   : > { %958 = vmatpush3.bf16.msra.mxu0 %v1117_v1  ;;  %1029 = vmatpush3.bf16.msra.mxu1 %v1117_v1  ;;  %v1121_v5 = vld [vmem:[#allocation6 + $0x28] sm:$0xff]   ;;  %v1122_v6 = vld [vmem:[#allocation6 + $0x60] sm:$0xff]   ;;  %v1124_v8 = vld [vmem:[#allocation6 + $0x58] sm:$0xff]   ;;  %s722_s21 = sshll.u32 %s1466_s19, 4  ;;  %s708_s12 = scalar_lea.sflag [#allocation5], %s1435_s7  ;;  %s1476_s21 = int_to_ptr.vmem [resolvable:$true] %s722_s21 }
  0x41   : > { %959 = vmatprep.subr.bf16.mxu0 %v1118_v2  ;;  %1022 = vmatprep.subr.bf16.mxu1 %v1118_v2  ;;  %v1123_v7 = vld [vmem:[#allocation6 + $0x20] sm:$0xff]   ;;  %v1125_v9 = vld [vmem:[#allocation6 + $0x18] sm:$0xff]   ;;  %v1126_v10 = vld [vmem:[#allocation6 + $0x50] sm:$0xff]   ;;  %s1210_s28 = scalar_lea.vmem %s1476_s21, 1024  ;;  %s1302_s29 = smov [#allocation8]  }
  0x42   : > { %v1134_v11 = vld [vmem:[%s1439_s23 + $0x4] ss:$8 sps:$4 sm:$0xff]   ;;  %v1127_v13 = vld [vmem:[#allocation6 + $0x10] sm:$0xff]   ;;  %v1132_v18 = vld [vmem:[%s1439_s23] ss:$8 sps:$4 sm:$0xff]   ;;  %p1211_p1 = scmp.ne.s32.totalorder %s1476_s21, %s1210_s28  ;;  %s1214_s30 = sshll.u32 %s1302_s29, 4  ;;  %s1215_s30 = int_to_ptr.vmem [resolvable:$false] %s1214_s30 }
  0x43   : > { %v1137_v12 = vld [vmem:[%s1439_s23 + $0x44] ss:$8 sps:$4 sm:$0xff]   ;;  %511 = vmatprep.mubr.bf16.mxu0 %v1134_v11  ;;  %v1135_v19 = vld [vmem:[%s1439_s23 + $0x40] ss:$8 sps:$4 sm:$0xff]   ;;  %v1138_v20 = vld [vmem:[%s1439_s23 + $0x14] ss:$8 sps:$4 sm:$0xff]   ;;  %p1217_p0 = scmp.lt.s32.totalorder %s1476_s21, %s1215_s30 }
  0x44   : > { %960 = vmatpush3.bf16.msra.mxu0 %v1119_v3  ;;  %1030 = vmatpush3.bf16.msra.mxu1 %v1119_v3  ;;  %v1128_v14 = vld [vmem:[#allocation6 + $0x48] sm:$0xff]   ;;  %v1130_v16 = vld [vmem:[#allocation6 + $0x40] sm:$0xff]   ;;  %v1140_v21 = vld [vmem:[%s1439_s23 + $0x54] ss:$8 sps:$4 sm:$0xff]   ;;  %p1212_p8 = pnand %p1211_p1, %p1407_p13  ;;  %s1216_s3 = scalar_lea.vmem %s1215_s30, 2048 }
  0x45   : > { %961 = vmatprep.subr.bf16.mxu0 %v1120_v4  ;;  %1023 = vmatprep.subr.bf16.mxu1 %v1120_v4  ;;  %v1129_v15 = vld [vmem:[#allocation6 + $0x8] sm:$0xff]   ;;  %v1131_v17 = vld [vmem:[#allocation6] sm:$0xff]   ;;  %v1142_v22 = vld [vmem:[%s1439_s23 + $0x10] ss:$8 sps:$4 sm:$0xff]   ;;  %p1218_p2 = scmp.lt.s32.totalorder %s1216_s3, %s1210_s28 }
  0x46   : > { %543 = vmatprep.mubr.bf16.mxu1 %v1137_v12  ;;  %v1143_v23 = vld [vmem:[%s1439_s23 + $0x50] ss:$8 sps:$4 sm:$0xff]   ;;  %v1144_v24 = vld [vmem:[%s1439_s23 + $0x24] ss:$8 sps:$4 sm:$0xff]   ;;  %v1148_v26 = vld [vmem:[%s1439_s23 + $0x20] ss:$8 sps:$4 sm:$0xff]   ;;  %p1213_p10 = pneg %p1212_p8 }
  0x47   : > { %v1146_v25 = vld [vmem:[%s1439_s23 + $0x64] ss:$8 sps:$4 sm:$0xff]   ;;  %v1149_v27 = vld [vmem:[%s1439_s23 + $0x60] ss:$8 sps:$4 sm:$0xff]   ;;  %v1150_v28 = vld [vmem:[%s1439_s23 + $0x34] ss:$8 sps:$4 sm:$0xff]   ;;  %p1219_p3 = por %p1218_p2, %p1217_p0 }
  0x48   : > { %962 = vmatpush3.bf16.msra.mxu0 %v1121_v5  ;;  %1031 = vmatpush3.bf16.msra.mxu1 %v1121_v5  ;;  %v1152_v29 = vld [vmem:[%s1439_s23 + $0x74] ss:$8 sps:$4 sm:$0xff]   ;;  %v1154_v30 = vld [vmem:[%s1439_s23 + $0x30] ss:$8 sps:$4 sm:$0xff]  }
  0x49   : > { %963 = vmatprep.subr.bf16.mxu0 %v1122_v6  ;;  %1024 = vmatprep.subr.bf16.mxu1 %v1122_v6  ;;  %v1155_v31 = vld [vmem:[%s1439_s23 + $0x70] ss:$8 sps:$4 sm:$0xff]   ;;  %p1220_p5 = pnand %p1219_p3, %p1213_p10 }
  0x4c   : > { %964 = vmatpush3.bf16.msra.mxu0 %v1123_v7  ;;  %1032 = vmatpush3.bf16.msra.mxu1 %v1123_v7 }
  0x4d   : > { %965 = vmatprep.subr.bf16.mxu0 %v1124_v8  ;;  %1025 = vmatprep.subr.bf16.mxu1 %v1124_v8 }
  0x50   : > { %966 = vmatpush3.bf16.msra.mxu0 %v1125_v9  ;;  %1033 = vmatpush3.bf16.msra.mxu1 %v1125_v9 }
  0x51   : > { %967 = vmatprep.subr.bf16.mxu0 %v1126_v10  ;;  %1026 = vmatprep.subr.bf16.mxu1 %v1126_v10 }
  0x54   : > { %968 = vmatpush3.bf16.msra.mxu0 %v1127_v13  ;;  %1034 = vmatpush3.bf16.msra.mxu1 %v1127_v13 }
  0x55   : > { %969 = vmatprep.subr.bf16.mxu0 %v1128_v14  ;;  %1027 = vmatprep.subr.bf16.mxu1 %v1128_v14 }
  0x58   : > { %970 = vmatpush3.bf16.msra.mxu0 %v1129_v15  ;;  %1035 = vmatpush3.bf16.msra.mxu1 %v1129_v15 }
  0x59   : > { %971 = vmatprep.subr.bf16.mxu0 %v1130_v16  ;;  %1028 = vmatprep.subr.bf16.mxu1 %v1130_v16 }
  0x5c   : > { %972 = vmatpush3.bf16.msra.mxu0 %v1131_v17  ;;  %1036 = vmatpush3.bf16.msra.mxu1 %v1131_v17 }
  0x5f   : > { %512 = vmatmul.mubr.bf16.vlgmr.msra.gmra.mxu0 %v1132_v18  ;;  %544 = vmatmul.mubr.bf16.vlgmr.msra.gmra.mxu1 %v1135_v19 }
  0x60   : > { %519 = vmatprep.mubr.bf16.mxu0 %v1138_v20  ;;  %551 = vmatprep.mubr.bf16.mxu1 %v1140_v21 }
  0x67   : > { %520 = vmatmul.mubr.bf16.gmra.mxu0 %v1142_v22  ;;  %552 = vmatmul.mubr.bf16.gmra.mxu1 %v1143_v23 }
  0x68   : > { %527 = vmatprep.mubr.bf16.mxu0 %v1144_v24  ;;  %559 = vmatprep.mubr.bf16.mxu1 %v1146_v25 }
  0x6f   : > { %528 = vmatmul.mubr.bf16.gmra.mxu0 %v1148_v26  ;;  %560 = vmatmul.mubr.bf16.gmra.mxu1 %v1149_v27 }
  0x70   : > { %535 = vmatprep.mubr.bf16.mxu0 %v1150_v28  ;;  %567 = vmatprep.mubr.bf16.mxu1 %v1152_v29 }
  0x77   : > { %536 = vmatmul.mubr.bf16.gmra.mxu0 %v1154_v30  ;;  %568 = vmatmul.mubr.bf16.gmra.mxu1 %v1155_v31 }
 0x11f   : > { %v973_v32 = vpop.f32.mrf.mxu0  ;;  %v997_v33 = vpop.f32.mrf.mxu1 }
 0x121   : > { %v974_v34 = vpop.f32.mrf.mxu0  ;;  %v998_v35 = vpop.f32.mrf.mxu1 }
 0x122   : > { %v975_v40 = vadd.f32 %v974_v34, %v973_v32  ;;  %v999_v41 = vadd.f32 %v998_v35, %v997_v33 }
 0x123   : > { %v976_v36 = vpop.f32.mrf.mxu0  ;;  %v1000_v37 = vpop.f32.mrf.mxu1 }
 0x125   : > { %v977_v38 = vpop.f32.mrf.mxu0  ;;  %v1001_v39 = vpop.f32.mrf.mxu1 }
 0x126   : > { %v978_v42 = vadd.f32 %v977_v38, %v976_v36  ;;  %v1002_v43 = vadd.f32 %v1001_v39, %v1000_v37 }
 0x127   : > { %v979_v44 = vpop.f32.mrf.mxu0  ;;  %v1003_v45 = vpop.f32.mrf.mxu1 }
 0x128   : > { %v913_v46 = vpack.c.bf16 %v978_v42, %v975_v40  ;;  %v933_v47 = vpack.c.bf16 %v1002_v43, %v999_v41 }
 0x129   : > { %v980_v48 = vpop.f32.mrf.mxu0  ;;  %v1004_v49 = vpop.f32.mrf.mxu1 }
 0x12a   : > { %914 = vst [vmem:[%s1466_s19] sm:$0xff] %v913_v46   ;;  %953 = vst [vmem:[%s1466_s19 + $0x20] sm:$0xff] %v933_v47   ;;  %v981_v54 = vadd.f32 %v980_v48, %v979_v44  ;;  %v1005_v55 = vadd.f32 %v1004_v49, %v1003_v45 }
 0x12b   : > { %v982_v50 = vpop.f32.mrf.mxu0  ;;  %v1006_v51 = vpop.f32.mrf.mxu1 }
 0x12d   : > { %v983_v52 = vpop.f32.mrf.mxu0  ;;  %v1007_v53 = vpop.f32.mrf.mxu1 }
 0x12e   : > { %v984_v56 = vadd.f32 %v983_v52, %v982_v50  ;;  %v1008_v57 = vadd.f32 %v1007_v53, %v1006_v51 }
 0x12f   : > { %v985_v58 = vpop.f32.mrf.mxu0  ;;  %v1009_v59 = vpop.f32.mrf.mxu1 }
 0x130   : > { %v918_v60 = vpack.c.bf16 %v984_v56, %v981_v54  ;;  %v938_v61 = vpack.c.bf16 %v1008_v57, %v1005_v55 }
 0x131   : > { %v986_v62 = vpop.f32.mrf.mxu0  ;;  %v1010_v63 = vpop.f32.mrf.mxu1 }
 0x132   : > { %950 = vst [vmem:[%s1466_s19 + $0x8] sm:$0xff] %v918_v60   ;;  %954 = vst [vmem:[%s1466_s19 + $0x28] sm:$0xff] %v938_v61   ;;  %v987_v4 = vadd.f32 %v986_v62, %v985_v58  ;;  %v1011_v5 = vadd.f32 %v1010_v63, %v1009_v59 }
 0x133   : > { %v988_v0 = vpop.f32.mrf.mxu0  ;;  %v1012_v1 = vpop.f32.mrf.mxu1 }
 0x135   : > { %v989_v2 = vpop.f32.mrf.mxu0  ;;  %v1013_v3 = vpop.f32.mrf.mxu1 }
 0x136   : > { %v990_v6 = vadd.f32 %v989_v2, %v988_v0  ;;  %v1014_v7 = vadd.f32 %v1013_v3, %v1012_v1 }
 0x137   : > { %v991_v8 = vpop.f32.mrf.mxu0  ;;  %v1015_v9 = vpop.f32.mrf.mxu1 }
 0x138   : > { %v923_v10 = vpack.c.bf16 %v990_v6, %v987_v4  ;;  %v943_v11 = vpack.c.bf16 %v1014_v7, %v1011_v5 }
 0x139   : > { %v992_v12 = vpop.f32.mrf.mxu0  ;;  %v1016_v13 = vpop.f32.mrf.mxu1 }
 0x13a   : > { %951 = vst [vmem:[%s1466_s19 + $0x10] sm:$0xff] %v923_v10   ;;  %955 = vst [vmem:[%s1466_s19 + $0x30] sm:$0xff] %v943_v11   ;;  %v993_v18 = vadd.f32 %v992_v12, %v991_v8  ;;  %v1017_v19 = vadd.f32 %v1016_v13, %v1015_v9 }
 0x13b   : > { %v994_v14 = vpop.f32.mrf.mxu0  ;;  %v1018_v15 = vpop.f32.mrf.mxu1 }
 0x13d   : > { %v995_v16 = vpop.f32.mrf.mxu0  ;;  %v1019_v17 = vpop.f32.mrf.mxu1 }
 0x13e   : > { %v996_v20 = vadd.f32 %v995_v16, %v994_v14  ;;  %v1020_v21 = vadd.f32 %v1019_v17, %v1018_v15 }
 0x140   : > { %v928_v22 = vpack.c.bf16 %v996_v20, %v993_v18  ;;  %v948_v23 = vpack.c.bf16 %v1020_v21, %v1017_v19 }
 0x142   : > { %952 = vst [vmem:[%s1466_s19 + $0x18] sm:$0xff] %v928_v22   ;;  %956 = vst [vmem:[%s1466_s19 + $0x38] sm:$0xff] %v948_v23  }
 0x143   : > { %1223 = shalt.err (!%p1220_p5)
}
 0x144   : > { %s1224_s6 = scalar_lea.hbm %s1481_s18, 1024  ;;  %s1228_s16 = scalar_lea.hbm %s1533_s2, 2048 }
 0x145   : > { %p1225_p7 = scmp.ne.s32.totalorder %s1481_s18, %s1224_s6  ;;  %p1229_p9 = scmp.lt.s32.totalorder %s1481_s18, %s1533_s2 }
 0x146   : > { %p1230_p11 = scmp.lt.s32.totalorder %s1228_s16, %s1224_s6 }
 0x147   : > { %p1226_p6 = pnand %p1225_p7, %p1407_p13 }
 0x148   : > { %p1231_p12 = por %p1230_p11, %p1229_p9 }
 0x149   : > { %p1227_p4 = pneg %p1226_p6 }
 0x14b   : > { %p1232_p1 = pnand %p1231_p12, %p1227_p4 }
 0x14d   : > { %1235 = shalt.err (!%p1232_p1)
}
 0x14e   : > { %s1303_s17 = smov 64   ;;  %s1304_s19 = smov 4  }
 0x14f   : > { %1043 = dma.vmem_to_hbm [thread:$0]  (%p1407_p13), %s1476_s21, 1024, %s1481_s18, %s708_s12, %s1303_s17, %s1303_s17, %s1304_s19  }
 0x150 PF: > { %s737_s24 = sand.u32 1, %s1274_s9   ;;  %p1545_p8 = scmp.ne.s32.totalorder %s1538_s20, 0 }
 0x151   : > { %p1546_p10 = scmp.ge.s32.totalorder %s1294_s14, 2  ;;  %s738_s26 = scalar_lea.sflag [#allocation5], %s737_s24 }
 0x153   : > { %p1054_p0 = pnand %p1546_p10, %p1545_p8 }
 0x155   : > { %p1055_p2 = pneg %p1054_p0 }
 0x157   : > { %1269 = dma.done.wait (%p1055_p2), %s738_s26, 1024  }
 0x158   : > { %1271 = vsyncadd (%p1055_p2), %s738_s26, 4294966272  ;;  %s19_s14 = sadd.s32 1, %s1294_s14   ;;  %s1547_s9 = smov %s1278_s10 }
 0x159   : > { %p16_p3 = scmp.ge.s32.totalorder %s19_s14, 4   ;;  %s1548_s10 = smov %s1282_s11 }
 0x15a   : > { %s1549_s11 = smov %s1416_s15  ;;  %s1550_s12 = smov %s1290_s13 }
 0x15b   : > { %s1551_s13 = smov %s1553_s25  ;;  %18 = sbr.rel (!%p16_p3) target bundleno = 7 (0x7), region = 87 }
 0x160   :  { %743 = vsyncpa [#allocation4], 1 }
 0x161   :  { %745 = vsyncpa [#allocation4 + $0x1], 1 }
 0x162   :  { %746 = vsyncpa [#allocation7], 1 }
 0x163   :  { %747 = vsyncpa [#allocation5], 1 }
 0x164   :  { %749 = vsyncpa [#allocation5 + $0x1], 1 }

</bundles_post_ra>
